<compile_context>
chip_gen: v5e
topology: v5e:2x2
jax: 0.10.0
libtpu: 0.0.40
codegen_flags: <defaults>
</compile_context>

<pallas_src>
import jax
import jax.numpy as jnp
from jax.experimental import pallas as pl
from jax.experimental.pallas import tpu as pltpu  # imported for TPU backend use; no TPU-specific params needed here

N = 3          # logical matrix size (the PyTorch module works on 3x3 tensors)
SUB = 8        # f32 sublane tile
LANE = 128     # lane tile
NUM_SLABS = 9  # (SUB, LANE) operand slabs stacked into one input

# Slab indices inside the stacked input.
_INP, _X1, _X2, _X6, _X9, _C1T, _C2, _V1C, _P2R = range(NUM_SLABS)


def model_kernel(s_ref, o_ref):
    """s_ref: (NUM_SLABS, 8, 128) f32 VMEM; o_ref: (8, 128) f32 VMEM.

    Slab layout (only the top-left 3x3 / first 3 entries are meaningful):
      _INP : inp
      _X1  : x1
      _X2  : x2
      _X6  : x6
      _X9  : x9
      _C1T : (x3 + x4 + 2*x5)^T            (constant-folded in the wrapper)
      _C2  : x6 + x7                       (constant-folded epilogue)
      _V1C : (inp @ perm1) broadcast along lanes   (sublane k holds v1[k])
      _P2R : perm2 broadcast along sublanes        (lane k holds perm2[k])
    """
    inp = s_ref[_INP]
    x1 = s_ref[_X1]
    x2 = s_ref[_X2]
    x6 = s_ref[_X6]
    x9 = s_ref[_X9]
    c1t = s_ref[_C1T]
    c2 = s_ref[_C2]
    v1c = s_ref[_V1C]
    p2r = s_ref[_P2R]

    def matvec_rows(lhs, rhs):
        # out[i, j] = sum_{k < N} lhs[i, k] * rhs[k, j]
        # 3-term unrolled VPU multiply-add (outer products of a lane slice of
        # lhs with a sublane slice of rhs); avoids feeding the MXU a
        # mostly-zero contraction and keeps the result lane-dense (8, 128).
        acc = lhs[:, 0:1] * rhs[0:1, :]
        for k in range(1, N):
            acc = acc + lhs[:, k:k + 1] * rhs[k:k + 1, :]
        return acc

    # v2 = inp @ x1 ; v3 = v2 * x2 ; v7 = v3 + x6 ; v8 = v7 * x9
    v2 = matvec_rows(inp, x1)
    v8 = (v2 * x2 + x6) * x9

    # v9^T = v1 (column-broadcast) + (x3 + x4 + 2*x5)^T
    v9t = v1c + c1t
    # v10 row-broadcast: out[i, j] = sum_k perm2[k] * v9[j, k]
    v10 = matvec_rows(p2r, v9t)

    # y2 + x7 = v8 + v10 + x6 + x7   (v12 / y1 are dead code in the module)
    o_ref[...] = v8 + v10 + c2


def _pad_mat(a):
    a = jnp.asarray(a, jnp.float32)
    return jnp.pad(a, ((0, SUB - a.shape[0]), (0, LANE - a.shape[1])))


def _row_bcast(v):
    v = jnp.asarray(v, jnp.float32)
    row = jnp.pad(v, (0, LANE - v.shape[0]))
    return jnp.broadcast_to(row[None, :], (SUB, LANE))


def _col_bcast(v):
    v = jnp.asarray(v, jnp.float32)
    col = jnp.pad(v, (0, SUB - v.shape[0]))
    return jnp.broadcast_to(col[:, None], (SUB, LANE))


def model_forward(x1, x2, x3, x4_scalar, x5, x6, x7, x8, x9, inp, perm1, perm2):
    del x8  # only feeds v12 / y1 in the reference module, which are discarded
    f32 = jnp.float32
    inp = jnp.asarray(inp, f32)

    # Input-side precompute on the raw 3x3 data (trivial XLA work):
    v1 = inp @ jnp.asarray(perm1, f32)                                  # first mm
    c1t = (jnp.asarray(x3, f32) + jnp.asarray(x4_scalar, f32)
           + 2.0 * jnp.asarray(x5, f32)).T                              # x3+x4+2*x5, transposed
    c2 = jnp.asarray(x6, f32) + jnp.asarray(x7, f32)                    # epilogue fold

    stacked = jnp.stack([
        _pad_mat(inp), _pad_mat(x1), _pad_mat(x2), _pad_mat(x6), _pad_mat(x9),
        _pad_mat(c1t), _pad_mat(c2),
        _col_bcast(v1), _row_bcast(jnp.asarray(perm2, f32)),
    ])                                                                  # (9, 8, 128)

    out = pl.pallas_call(
        model_kernel,
        out_shape=jax.ShapeDtypeStruct((SUB, LANE), jnp.float32),
        in_specs=[pl.BlockSpec((NUM_SLABS, SUB, LANE), lambda: (0, 0, 0))],
        out_specs=pl.BlockSpec((SUB, LANE), lambda: (0, 0)),
    )(stacked)

    return out[:N, :N]


def model_reference(x1, x2, x3, x4_scalar, x5, x6, x7, x8, x9, inp,
                    perm1, perm2):
    """Pure-JAX reference mirroring the PyTorch forward (broadcast semantics)."""
    v1 = inp @ perm1.astype(jnp.float32)            # (N,)
    v2 = inp @ x1
    v3 = v2 * x2
    v4 = v1 + x3                                    # row broadcast
    v5 = v4 + jnp.float32(x4_scalar)
    v6 = v5 + x5
    v7 = v3 + x6
    v8 = v7 * x9
    v9 = v6 + x5
    v10 = v9 @ perm2.astype(jnp.float32)            # (N,)
    v11 = v8 + v10
    y2 = v11 + x6
    return y2 + x7


if __name__ == "__main__":
    key = jax.random.PRNGKey(0)
    k3, k6, k7, k9, kp1, kp2 = jax.random.split(key, 6)

    # Inputs matching the PyTorch test harness (all 3x3, f32):
    x1 = jnp.zeros((N, N), jnp.float32)                         # torch.zeros
    x2 = jnp.ones((N, N), jnp.float32)                          # torch.ones
    x3 = jax.random.normal(k3, (N, N), jnp.float32)             # torch.empty -> deterministic randn
    x4 = 3                                                      # torch.tensor(3)
    x5 = jnp.eye(N, dtype=jnp.float32)                          # torch.eye
    x6 = jax.random.normal(k6, (N, N), jnp.float32)             # torch.randn
    x7 = jax.random.normal(k7, (N, N), jnp.float32)             # torch.empty -> deterministic randn
    x8 = jnp.ones((N, N), jnp.float32)                          # torch.ones (unused downstream)
    x9 = inp = jax.random.normal(k9, (N, N), jnp.float32)       # x9 = inp = torch.randn

    # Deterministic stand-ins for torch.randperm(3) (drawn once per use site).
    perm1 = jax.random.permutation(kp1, N)
    perm2 = jax.random.permutation(kp2, N)

    y = model_forward(x1, x2, x3, x4, x5, x6, x7, x8, x9, inp, perm1, perm2)
    y = jax.block_until_ready(y)

    y_ref = model_reference(x1, x2, x3, x4, x5, x6, x7, x8, x9, inp,
                            perm1, perm2)
    assert y.shape == (N, N) and y.dtype == jnp.float32
    assert jnp.allclose(y, y_ref, atol=1e-5, rtol=1e-5)

    print("KERNEL_OK")
</pallas_src>

<mosaic_0001>
module attributes {stable_mosaic.version = 11 : i64} {
  func.func @model_kernel(%arg0: memref<9x8x128xf32, #tpu.memory_space<vmem>>, %arg1: memref<8x128xf32, #tpu.memory_space<vmem>>) attributes {dimension_semantics = [], scalar_prefetch = 0 : i64, scratch_operands = 0 : i64, tpu.core_type = #tpu.core_type<tc>} {
    %c0 = arith.constant 0 : index
    %c0_0 = arith.constant 0 : index
    %c0_1 = arith.constant 0 : index
    %0 = vector.load %arg0[%c0, %c0_0, %c0_1] : memref<9x8x128xf32, #tpu.memory_space<vmem>>, vector<1x8x128xf32>
    %1 = vector.shape_cast %0 : vector<1x8x128xf32> to vector<8x128xf32>
    %c1 = arith.constant 1 : index
    %c0_2 = arith.constant 0 : index
    %c0_3 = arith.constant 0 : index
    %2 = vector.load %arg0[%c1, %c0_2, %c0_3] : memref<9x8x128xf32, #tpu.memory_space<vmem>>, vector<1x8x128xf32>
    %3 = vector.shape_cast %2 : vector<1x8x128xf32> to vector<8x128xf32>
    %c2 = arith.constant 2 : index
    %c0_4 = arith.constant 0 : index
    %c0_5 = arith.constant 0 : index
    %4 = vector.load %arg0[%c2, %c0_4, %c0_5] : memref<9x8x128xf32, #tpu.memory_space<vmem>>, vector<1x8x128xf32>
    %5 = vector.shape_cast %4 : vector<1x8x128xf32> to vector<8x128xf32>
    %c3 = arith.constant 3 : index
    %c0_6 = arith.constant 0 : index
    %c0_7 = arith.constant 0 : index
    %6 = vector.load %arg0[%c3, %c0_6, %c0_7] : memref<9x8x128xf32, #tpu.memory_space<vmem>>, vector<1x8x128xf32>
    %7 = vector.shape_cast %6 : vector<1x8x128xf32> to vector<8x128xf32>
    %c4 = arith.constant 4 : index
    %c0_8 = arith.constant 0 : index
    %c0_9 = arith.constant 0 : index
    %8 = vector.load %arg0[%c4, %c0_8, %c0_9] : memref<9x8x128xf32, #tpu.memory_space<vmem>>, vector<1x8x128xf32>
    %9 = vector.shape_cast %8 : vector<1x8x128xf32> to vector<8x128xf32>
    %c5 = arith.constant 5 : index
    %c0_10 = arith.constant 0 : index
    %c0_11 = arith.constant 0 : index
    %10 = vector.load %arg0[%c5, %c0_10, %c0_11] : memref<9x8x128xf32, #tpu.memory_space<vmem>>, vector<1x8x128xf32>
    %11 = vector.shape_cast %10 : vector<1x8x128xf32> to vector<8x128xf32>
    %c6 = arith.constant 6 : index
    %c0_12 = arith.constant 0 : index
    %c0_13 = arith.constant 0 : index
    %12 = vector.load %arg0[%c6, %c0_12, %c0_13] : memref<9x8x128xf32, #tpu.memory_space<vmem>>, vector<1x8x128xf32>
    %13 = vector.shape_cast %12 : vector<1x8x128xf32> to vector<8x128xf32>
    %c7 = arith.constant 7 : index
    %c0_14 = arith.constant 0 : index
    %c0_15 = arith.constant 0 : index
    %14 = vector.load %arg0[%c7, %c0_14, %c0_15] : memref<9x8x128xf32, #tpu.memory_space<vmem>>, vector<1x8x128xf32>
    %15 = vector.shape_cast %14 : vector<1x8x128xf32> to vector<8x128xf32>
    %c8 = arith.constant 8 : index
    %c0_16 = arith.constant 0 : index
    %c0_17 = arith.constant 0 : index
    %16 = vector.load %arg0[%c8, %c0_16, %c0_17] : memref<9x8x128xf32, #tpu.memory_space<vmem>>, vector<1x8x128xf32>
    %17 = vector.shape_cast %16 : vector<1x8x128xf32> to vector<8x128xf32>
    %18 = vector.extract_strided_slice %1 {offsets = [0, 0], sizes = [8, 1], strides = [1, 1]} : vector<8x128xf32> to vector<8x1xf32>
    %19 = vector.extract_strided_slice %3 {offsets = [0, 0], sizes = [1, 128], strides = [1, 1]} : vector<8x128xf32> to vector<1x128xf32>
    %20 = vector.broadcast %18 : vector<8x1xf32> to vector<8x128xf32>
    %21 = vector.broadcast %19 : vector<1x128xf32> to vector<8x128xf32>
    %22 = arith.mulf %20, %21 : vector<8x128xf32>
    %23 = vector.extract_strided_slice %1 {offsets = [0, 1], sizes = [8, 1], strides = [1, 1]} : vector<8x128xf32> to vector<8x1xf32>
    %24 = vector.extract_strided_slice %3 {offsets = [1, 0], sizes = [1, 128], strides = [1, 1]} : vector<8x128xf32> to vector<1x128xf32>
    %25 = vector.broadcast %23 : vector<8x1xf32> to vector<8x128xf32>
    %26 = vector.broadcast %24 : vector<1x128xf32> to vector<8x128xf32>
    %27 = arith.mulf %25, %26 : vector<8x128xf32>
    %28 = arith.addf %22, %27 : vector<8x128xf32>
    %29 = vector.extract_strided_slice %1 {offsets = [0, 2], sizes = [8, 1], strides = [1, 1]} : vector<8x128xf32> to vector<8x1xf32>
    %30 = vector.extract_strided_slice %3 {offsets = [2, 0], sizes = [1, 128], strides = [1, 1]} : vector<8x128xf32> to vector<1x128xf32>
    %31 = vector.broadcast %29 : vector<8x1xf32> to vector<8x128xf32>
    %32 = vector.broadcast %30 : vector<1x128xf32> to vector<8x128xf32>
    %33 = arith.mulf %31, %32 : vector<8x128xf32>
    %34 = arith.addf %28, %33 : vector<8x128xf32>
    %35 = arith.mulf %34, %5 : vector<8x128xf32>
    %36 = arith.addf %35, %7 : vector<8x128xf32>
    %37 = arith.mulf %36, %9 : vector<8x128xf32>
    %38 = arith.addf %15, %11 : vector<8x128xf32>
    %39 = vector.extract_strided_slice %17 {offsets = [0, 0], sizes = [8, 1], strides = [1, 1]} : vector<8x128xf32> to vector<8x1xf32>
    %40 = vector.extract_strided_slice %38 {offsets = [0, 0], sizes = [1, 128], strides = [1, 1]} : vector<8x128xf32> to vector<1x128xf32>
    %41 = vector.broadcast %39 : vector<8x1xf32> to vector<8x128xf32>
    %42 = vector.broadcast %40 : vector<1x128xf32> to vector<8x128xf32>
    %43 = arith.mulf %41, %42 : vector<8x128xf32>
    %44 = vector.extract_strided_slice %17 {offsets = [0, 1], sizes = [8, 1], strides = [1, 1]} : vector<8x128xf32> to vector<8x1xf32>
    %45 = vector.extract_strided_slice %38 {offsets = [1, 0], sizes = [1, 128], strides = [1, 1]} : vector<8x128xf32> to vector<1x128xf32>
    %46 = vector.broadcast %44 : vector<8x1xf32> to vector<8x128xf32>
    %47 = vector.broadcast %45 : vector<1x128xf32> to vector<8x128xf32>
    %48 = arith.mulf %46, %47 : vector<8x128xf32>
    %49 = arith.addf %43, %48 : vector<8x128xf32>
    %50 = vector.extract_strided_slice %17 {offsets = [0, 2], sizes = [8, 1], strides = [1, 1]} : vector<8x128xf32> to vector<8x1xf32>
    %51 = vector.extract_strided_slice %38 {offsets = [2, 0], sizes = [1, 128], strides = [1, 1]} : vector<8x128xf32> to vector<1x128xf32>
    %52 = vector.broadcast %50 : vector<8x1xf32> to vector<8x128xf32>
    %53 = vector.broadcast %51 : vector<1x128xf32> to vector<8x128xf32>
    %54 = arith.mulf %52, %53 : vector<8x128xf32>
    %55 = arith.addf %49, %54 : vector<8x128xf32>
    %56 = arith.addf %37, %55 : vector<8x128xf32>
    %57 = arith.addf %56, %13 : vector<8x128xf32>
    %c0_18 = arith.constant 0 : index
    %c0_19 = arith.constant 0 : index
    %58 = vector.load %arg1[%c0_18, %c0_19] : memref<8x128xf32, #tpu.memory_space<vmem>>, vector<8x128xf32>
    tpu.vector_store %arg1[%c0_18, %c0_19], %57 {strides = array<i32>} : memref<8x128xf32, #tpu.memory_space<vmem>>, vector<8x128xf32>,
    return
  }
}

</mosaic_0001>

<bundles_post_ra>
// kernel: tpu_custom_call.1
= control target key start
LH: loop header
LB: loop body
LE: loop exit
PB: predicated region body
PF: predicated region fallthrough
CT: control target
= control target key end

     0   :  { %6 = vsyncpa [#allocation3], 0  ;;  %s197_s0 = inlined_call_operand.hbm [shape: f32[9,8,128], index: 0, kind: input, shape index: {}]   ;;  %s198_s1 = inlined_call_operand.hbm [shape: f32[8,128], index: 1, kind: output, shape index: {}]  }
   0x1   :  { %7 = vsyncpa [#allocation4], 0  ;;  %s12_s8 = sshll.u32 %s197_s0, 4  ;;  %s174_s9 = smov [#allocation2]   ;;  %s13_s8 = int_to_ptr.hbm [resolvable:$true] %s12_s8 }
   0x2   :  { %s14_s10 = sshll.u32 %s174_s9, 4  ;;  %s175_s11 = smov 128   ;;  %s15_s10 = int_to_ptr.vmem [resolvable:$true] %s14_s10 }
   0x3   :  { %s176_s12 = smov 8  }
   0x4   :  { %20 = dma.hbm_to_vmem [thread:$0]  %s13_s8, 1152, %s15_s10, [#allocation3], %s175_s11, %s175_s11, %s176_s12  }
   0x5   :  { %170 = dma.done.wait [#allocation3], 1152  }
   0x6   :  { %171 = vsyncadd [#allocation3], 4294966144  ;;  %v177_v0 = vmov 2   ;;  %v178_v1 = vmov 0   ;;  %v179_v2 = vmov 1   ;;  %v25_v3 = vld [vmem:[#allocation2] sm:$0xff] }
   0x7   :  { %117 = vset.pattern.permute.xlu1 %v177_v0  ;;  %115 = vset.pattern.permute.xlu0 %v178_v1  ;;  %v41_v4 = vld [vmem:[#allocation2 + $0x40] sm:$0xff]  ;;  %v35_v7 = vld [vmem:[#allocation2 + $0x28] sm:$0xff]  ;;  %v39_v8 = vld [vmem:[#allocation2 + $0x38] sm:$0xff]  ;;  %s180_s0 = smov [#allocation5]   ;;  %s98_s16 = sshll.u32 %s198_s1, 4  ;;  %s99_s16 = int_to_ptr.hbm [resolvable:$true] %s98_s16 }
   0x8   :  { %119 = vset.pattern.permute.xlu2 %v179_v2  ;;  %57 = vperm.xlu1 %117, %v25_v3   ;;  %v27_v9 = vld [vmem:[#allocation2 + $0x8] sm:$0xff]  ;;  %v66_v11 = vadd.f32 %v39_v8, %v35_v7  ;;  %v29_v26 = vld [vmem:[#allocation2 + $0x10] sm:$0xff]  ;;  %v31_v29 = vld [vmem:[#allocation2 + $0x18] sm:$0xff]  ;;  %s96_s13 = sshll.u32 %s180_s0, 4  ;;  %s97_s13 = int_to_ptr.vmem [resolvable:$true] %s96_s13 }
   0x9   :  { %44 = vperm.xlu0 %115, %v25_v3   ;;  %75 = vperm.xlu2 %119, %v41_v4   ;;  %v47_v12 = vperm.slane %v27_v9, 0  ;;  %v53_v13 = vperm.slane %v27_v9, 1  ;;  %v60_v15 = vperm.slane %v27_v9, 2  ;;  %v33_v33 = vld [vmem:[#allocation2 + $0x20] sm:$0xff]  ;;  %v37_v37 = vld [vmem:[#allocation2 + $0x30] sm:$0xff] }
   0xa   :  { %v78_v14 = vperm.slane %v66_v11, 1  ;;  %v72_v16 = vperm.slane %v66_v11, 0  ;;  %v85_v25 = vperm.slane %v66_v11, 2 }
  0x10   :  { %118 = vset.pattern.permute.xlu1 %v178_v1 }
  0x11   :  { %116 = vset.pattern.permute.xlu0 %v179_v2  ;;  %69 = vperm.xlu1 %118, %v41_v4  }
  0x12   :  { %50 = vperm.xlu0 %116, %v25_v3   ;;  %120 = vset.pattern.permute.xlu2 %v177_v0 }
  0x13   :  { %82 = vperm.xlu2 %120, %v41_v4  }
  0x1a   :  { %121 = vset.pattern.permute.xlu0 %v177_v0 }
  0x63   :  { %v76_v10 = vpop.permute.xlu2 %75 }
  0x64   :  { %v79_v21 = vmul.f32 %v78_v14, %v76_v10 }
  0x6d   :  { %v83_v27 = vpop.permute.xlu2 %82 }
  0x6e   :  { %v86_v32 = vmul.f32 %v85_v25, %v83_v27 }
  0x7a   :  { %v58_v6 = vpop.permute.xlu1 %57 }
  0x7b   :  { %v45_v5 = vpop.permute.xlu0 %44  ;;  %v61_v22 = vmul.f32 %v60_v15, %v58_v6 }
  0x7c   :  { %v48_v19 = vmul.f32 %v47_v12, %v45_v5 }
  0x83   :  { %v70_v17 = vpop.permute.xlu1 %69 }
  0x84   :  { %v51_v18 = vpop.permute.xlu0 %50  ;;  %v73_v23 = vmul.f32 %v72_v16, %v70_v17 }
  0x85   :  { %v54_v20 = vmul.f32 %v53_v13, %v51_v18 }
  0x86   :  { %v80_v30 = vadd.f32 %v79_v21, %v73_v23 }
  0x87   :  { %v55_v24 = vadd.f32 %v54_v20, %v48_v19 }
  0x88   :  { %v87_v36 = vadd.f32 %v86_v32, %v80_v30 }
  0x89   :  { %v62_v28 = vadd.f32 %v61_v22, %v55_v24 }
  0x8b   :  { %v63_v31 = vmul.f32 %v62_v28, %v29_v26 }
  0x8d   :  { %v64_v34 = vadd.f32 %v63_v31, %v31_v29 }
  0x8f   :  { %v65_v35 = vmul.f32 %v64_v34, %v33_v33 }
  0x91   :  { %v88_v38 = vadd.f32 %v87_v36, %v65_v35 }
  0x93   :  { %v89_v39 = vadd.f32 %v88_v38, %v37_v37 }
  0x95   :  { %90 = vst [vmem:[#allocation5] sm:$0xff] %v89_v39 }
  0x96   :  { %101 = dma.vmem_to_hbm [thread:$0]  %s97_s13, 128, %s99_s16, [#allocation4]  }
  0x97   :  { %172 = dma.done.wait [#allocation4], 128  }
  0x98   :  { %173 = vsyncadd [#allocation4], 4294967168 }
  0x99   :  { %106 = vsyncpa [#allocation3], 1 }
  0x9a   :  { %107 = vsyncpa [#allocation4], 1 }

</bundles_post_ra>
